<compile_context>
chip_gen: v5e
topology: v5e:2x2
jax: 0.10.0
libtpu: 0.0.40
codegen_flags: <defaults>
</compile_context>

<pallas_src>
import jax
import jax.numpy as jnp
from jax import lax
from jax.experimental import pallas as pl
from jax.experimental.pallas import tpu as pltpu

D_EMB = 128
D_DE = 11
D_H1 = 64
D_H2 = 32
D_OUT = 1

TILE_B_MAX = 8192                      # cross-generation sweet spot (see header)
VMEM_LIMIT_BYTES = 48 * 1024 * 1024    # explicit scoped-VMEM limit (fits v7x 64 MiB)


def ccnn_fc_kernel(emb_ref, de_ref, w1a_ref, w1b_ref, b1_ref,
                   w2t_ref, b2_ref, w3_ref, b3_ref, o_ref):
    """One batch tile: (tb,128)+(tb,11) -> (1,1,tb) lane-dense logits row."""
    # Layer 1: fused concat as a split matmul (bf16 MXU, f32 accumulate).
    h1 = jnp.dot(emb_ref[...], w1a_ref[...], preferred_element_type=jnp.float32)
    h1 = h1 + jnp.dot(de_ref[...], w1b_ref[...], preferred_element_type=jnp.float32)
    h1 = jnp.maximum(h1 + b1_ref[...], 0.0)          # ReLU; Dropout(0.2) = identity (eval)

    # Layer 2.
    h2 = jnp.dot(h1.astype(jnp.bfloat16), w2t_ref[...],
                 preferred_element_type=jnp.float32) + b2_ref[...]
    h2 = jnp.maximum(h2, 0.0)                         # ReLU; Dropout(0.2) = identity (eval)

    # Layer 3, emitted lane-dense: (1,32) contracted with (tb,32) -> (1, tb).
    out_row = lax.dot_general(
        w3_ref[...], h2.astype(jnp.bfloat16),
        dimension_numbers=(((1,), (1,)), ((), ())),
        preferred_element_type=jnp.float32) + b3_ref[...]
    o_ref[...] = out_row.reshape(1, 1, out_row.shape[-1]).astype(o_ref.dtype)


def init_params(key):
    """Deterministic synthetic parameters in nn.Linear (out, in) layout, f32."""
    k1, k2, k3, k4, k5, k6 = jax.random.split(key, 6)

    def xavier(k, shape):
        fan_out, fan_in = shape
        std = (2.0 / (fan_in + fan_out)) ** 0.5
        return std * jax.random.normal(k, shape, dtype=jnp.float32)

    w1 = xavier(k1, (D_H1, D_EMB + D_DE))   # (64, 139)
    b1 = 0.01 * jax.random.normal(k2, (D_H1,), dtype=jnp.float32)
    w2 = xavier(k3, (D_H2, D_H1))           # (32, 64)
    b2 = 0.01 * jax.random.normal(k4, (D_H2,), dtype=jnp.float32)
    w3 = xavier(k5, (D_OUT, D_H2))          # (1, 32)
    b3 = 0.01 * jax.random.normal(k6, (D_OUT,), dtype=jnp.float32)
    return (w1, b1, w2, b2, w3, b3)


def prepare_params(params):
    """One-time layout/dtype prep (hoisted out of the per-batch forward).

    W1 is split along its input dim into the embedding (128) and de_feature (11)
    parts and transposed to (in, out) so the kernel computes y = x @ W on the
    MXU.  Weights are stored bf16 (MXU-native on v5e/v6e/v7x); biases stay f32
    so post-matmul VPU math is f32 everywhere.
    """
    w1, b1, w2, b2, w3, b3 = params
    w1_t = w1.T                                          # (139, 64)
    return (w1_t[:D_EMB, :].astype(jnp.bfloat16),        # W1a (128, 64)
            w1_t[D_EMB:, :].astype(jnp.bfloat16),        # W1b (11, 64)
            b1[None, :].astype(jnp.float32),             # (1, 64)
            w2.T.astype(jnp.bfloat16),                   # (64, 32)
            b2[None, :].astype(jnp.float32),             # (1, 32)
            w3.astype(jnp.bfloat16),                     # (1, 32)  row vector
            b3[None, :].astype(jnp.float32))             # (1, 1)


def prepare_inputs(embedding_v, de_feature):
    """Cast HBM-resident activations to bf16 once (ideally done by the producer)."""
    return embedding_v.astype(jnp.bfloat16), de_feature.astype(jnp.bfloat16)


def _round_up(x, m):
    return ((x + m - 1) // m) * m


@jax.jit
def ccnn_fc_forward(embedding_v, de_feature, prepared):
    """embedding_v (B,128) bf16, de_feature (B,11) bf16 -> logits (B,1) f32."""
    w1a, w1b, b1, w2t, b2, w3, b3 = prepared
    B = embedding_v.shape[0]

    # Batch tile: large enough to amortize per-step overhead, small enough for
    # v7x's 64 MiB VMEM, and split >=2 ways when B allows so the "parallel"
    # batch axis uses both v7x TensorCores.
    tb = min(TILE_B_MAX, _round_up(pl.cdiv(B, 2), 128))
    num_tiles = pl.cdiv(B, tb)

    batch2d = lambda d: pl.BlockSpec((tb, d), lambda i: (i, 0))
    # Constant index_map -> weights/biases are fetched once and stay VMEM-resident.
    const = lambda shape: pl.BlockSpec(shape, lambda i: (0, 0))

    flops = 2 * B * (D_EMB * D_H1 + D_DE * D_H1 + D_H1 * D_H2 + D_H2 * D_OUT)
    bytes_accessed = (B * (2 * (D_EMB + D_DE) + 4)
                      + 2 * ((D_EMB + D_DE) * D_H1 + D_H1 * D_H2 + D_H2 * D_OUT)
                      + 4 * (D_H1 + D_H2 + D_OUT))

    out = pl.pallas_call(
        ccnn_fc_kernel,
        out_shape=jax.ShapeDtypeStruct((num_tiles, 1, tb), jnp.float32),
        grid=(num_tiles,),
        in_specs=[
            batch2d(D_EMB),                 # embedding_v  (B, 128) bf16
            batch2d(D_DE),                  # de_feature   (B, 11)  bf16
            const((D_EMB, D_H1)),           # W1a          (128, 64)
            const((D_DE, D_H1)),            # W1b          (11, 64)
            const((1, D_H1)),               # b1           (1, 64)
            const((D_H1, D_H2)),            # W2^T         (64, 32)
            const((1, D_H2)),               # b2           (1, 32)
            const((D_OUT, D_H2)),           # W3 row       (1, 32)
            const((1, 1)),                  # b3           (1, 1)
        ],
        out_specs=pl.BlockSpec((1, 1, tb), lambda i: (i, 0, 0)),
        compiler_params=pltpu.CompilerParams(
            dimension_semantics=("parallel",),      # 2x across v7x's dual TC
            vmem_limit_bytes=VMEM_LIMIT_BYTES),
        cost_estimate=pl.CostEstimate(flops=flops, transcendentals=0,
                                      bytes_accessed=bytes_accessed),
    )(embedding_v, de_feature, w1a, w1b, b1, w2t, b2, w3, b3)

    # (num_tiles, 1, tb) lane-dense rows -> (B, 1); padded tail rows discarded.
    return out.reshape(num_tiles * tb)[:B].reshape(B, D_OUT)


def ccnn_fc_reference_f32(embedding_v, de_feature, params):
    """Pure-f32 reference mirroring the PyTorch forward (eval mode)."""
    w1, b1, w2, b2, w3, b3 = params
    x = jnp.concatenate([embedding_v, de_feature], axis=1)
    h = jnp.maximum(x @ w1.T + b1, 0.0)
    h = jnp.maximum(h @ w2.T + b2, 0.0)
    return h @ w3.T + b3


def ccnn_fc_reference_bf16(emb_bf16, de_bf16, prepared):
    """Reference with the same bf16 rounding points as the kernel (f32 math)."""
    w1a, w1b, b1, w2t, b2, w3, b3 = prepared
    f32 = lambda a: a.astype(jnp.float32)
    h1 = jnp.maximum(f32(emb_bf16) @ f32(w1a) + f32(de_bf16) @ f32(w1b) + b1, 0.0)
    h2 = jnp.maximum(f32(h1.astype(jnp.bfloat16)) @ f32(w2t) + b2, 0.0)
    return f32(h2.astype(jnp.bfloat16)) @ f32(w3).T + b3


if __name__ == "__main__":
    key = jax.random.PRNGKey(0)
    k_emb, k_de, k_par = jax.random.split(key, 3)

    B = 2
    embedding_v = jax.random.normal(k_emb, (B, D_EMB), dtype=jnp.float32)   # (2, 128)
    de_feature = jax.random.normal(k_de, (B, D_DE), dtype=jnp.float32)      # (2, 11)

    params = init_params(k_par)
    prepared = prepare_params(params)                             # one-time weight prep
    emb_bf16, de_bf16 = prepare_inputs(embedding_v, de_feature)   # one-time act cast

    logits = ccnn_fc_forward(emb_bf16, de_bf16, prepared)
    logits = jax.block_until_ready(logits)
    assert logits.shape == (B, D_OUT)

    # Tight check vs a reference with identical bf16 rounding points.
    ref_bf16 = ccnn_fc_reference_bf16(emb_bf16, de_bf16, prepared)
    assert jnp.allclose(logits, ref_bf16, atol=1e-4, rtol=1e-4), \
        "mismatch vs bf16-matched reference"

    # Loose check vs the pure-f32 PyTorch-equivalent reference (bf16 inputs and
    # weights diverge from f32 at the ~1e-2 level, per the perf review).
    ref_f32 = ccnn_fc_reference_f32(embedding_v, de_feature, params)
    assert jnp.allclose(logits, ref_f32, atol=1e-1, rtol=1e-1), \
        "mismatch vs f32 reference"

    print("KERNEL_OK")
</pallas_src>

<mosaic_0001>
module attributes {stable_mosaic.version = 11 : i64} {
  func.func @ccnn_fc_kernel(%arg0: i32, %arg1: memref<128x128xbf16, #tpu.memory_space<vmem>>, %arg2: memref<128x11xbf16, #tpu.memory_space<vmem>>, %arg3: memref<128x64xbf16, #tpu.memory_space<vmem>>, %arg4: memref<11x64xbf16, #tpu.memory_space<vmem>>, %arg5: memref<1x64xf32, #tpu.memory_space<vmem>>, %arg6: memref<64x32xbf16, #tpu.memory_space<vmem>>, %arg7: memref<1x32xf32, #tpu.memory_space<vmem>>, %arg8: memref<1x32xbf16, #tpu.memory_space<vmem>>, %arg9: memref<1x1xf32, #tpu.memory_space<vmem>>, %arg10: memref<1x1x128xf32, #tpu.memory_space<vmem>>) attributes {dimension_semantics = [#tpu.dimension_semantics<parallel>], iteration_bounds = array<i64: 1>, scalar_prefetch = 0 : i64, scratch_operands = 0 : i64, tpu.core_type = #tpu.core_type<tc>, window_params = [{transform_indices = @transform_0, window_bounds = array<i64: 128, 128>}, {transform_indices = @transform_1, window_bounds = array<i64: 128, 11>}, {pipeline_mode = #tpu.pipeline_mode<synchronous>, transform_indices = @transform_2, window_bounds = array<i64: 128, 64>}, {pipeline_mode = #tpu.pipeline_mode<synchronous>, transform_indices = @transform_3, window_bounds = array<i64: 11, 64>}, {pipeline_mode = #tpu.pipeline_mode<synchronous>, transform_indices = @transform_4, window_bounds = array<i64: 1, 64>}, {pipeline_mode = #tpu.pipeline_mode<synchronous>, transform_indices = @transform_5, window_bounds = array<i64: 64, 32>}, {pipeline_mode = #tpu.pipeline_mode<synchronous>, transform_indices = @transform_6, window_bounds = array<i64: 1, 32>}, {pipeline_mode = #tpu.pipeline_mode<synchronous>, transform_indices = @transform_7, window_bounds = array<i64: 1, 32>}, {pipeline_mode = #tpu.pipeline_mode<synchronous>, transform_indices = @transform_8, window_bounds = array<i64: 1, 1>}, {transform_indices = @transform_9, window_bounds = array<i64: 1, 1, 128>}]} {
    %c0 = arith.constant 0 : index
    %c0_0 = arith.constant 0 : index
    %0 = vector.load %arg1[%c0, %c0_0] : memref<128x128xbf16, #tpu.memory_space<vmem>>, vector<128x128xbf16>
    %c0_1 = arith.constant 0 : index
    %c0_2 = arith.constant 0 : index
    %1 = vector.load %arg3[%c0_1, %c0_2] : memref<128x64xbf16, #tpu.memory_space<vmem>>, vector<128x64xbf16>
    %cst = arith.constant dense<0.000000e+00> : vector<128x64xf32>
    %2 = tpu.matmul %0, %1, %cst {dimension_numbers = #tpu.dot_dimension_numbers<[1], [0], [0], [1], [0, 0, 1, 1], [], []>} : vector<128x128xbf16>, vector<128x64xbf16>, vector<128x64xf32> -> vector<128x64xf32>
    %c0_3 = arith.constant 0 : index
    %c0_4 = arith.constant 0 : index
    %3 = vector.load %arg2[%c0_3, %c0_4] : memref<128x11xbf16, #tpu.memory_space<vmem>>, vector<128x11xbf16>
    %c0_5 = arith.constant 0 : index
    %c0_6 = arith.constant 0 : index
    %4 = vector.load %arg4[%c0_5, %c0_6] : memref<11x64xbf16, #tpu.memory_space<vmem>>, vector<11x64xbf16>
    %cst_7 = arith.constant dense<0.000000e+00> : vector<128x64xf32>
    %5 = tpu.matmul %3, %4, %cst_7 {dimension_numbers = #tpu.dot_dimension_numbers<[1], [0], [0], [1], [0, 0, 1, 1], [], []>} : vector<128x11xbf16>, vector<11x64xbf16>, vector<128x64xf32> -> vector<128x64xf32>
    %6 = arith.addf %2, %5 : vector<128x64xf32>
    %c0_8 = arith.constant 0 : index
    %c0_9 = arith.constant 0 : index
    %7 = vector.load %arg5[%c0_8, %c0_9] : memref<1x64xf32, #tpu.memory_space<vmem>>, vector<1x64xf32>
    %8 = vector.broadcast %7 : vector<1x64xf32> to vector<128x64xf32>
    %9 = arith.addf %6, %8 : vector<128x64xf32>
    %cst_10 = arith.constant 0.000000e+00 : f32
    %10 = vector.broadcast %cst_10 : f32 to vector<128x64xf32>
    %11 = arith.maximumf %9, %10 : vector<128x64xf32>
    %12 = arith.truncf %11 : vector<128x64xf32> to vector<128x64xbf16>
    %c0_11 = arith.constant 0 : index
    %c0_12 = arith.constant 0 : index
    %13 = vector.load %arg6[%c0_11, %c0_12] : memref<64x32xbf16, #tpu.memory_space<vmem>>, vector<64x32xbf16>
    %cst_13 = arith.constant dense<0.000000e+00> : vector<128x32xf32>
    %14 = tpu.matmul %12, %13, %cst_13 {dimension_numbers = #tpu.dot_dimension_numbers<[1], [0], [0], [1], [0, 0, 1, 1], [], []>} : vector<128x64xbf16>, vector<64x32xbf16>, vector<128x32xf32> -> vector<128x32xf32>
    %c0_14 = arith.constant 0 : index
    %c0_15 = arith.constant 0 : index
    %15 = vector.load %arg7[%c0_14, %c0_15] : memref<1x32xf32, #tpu.memory_space<vmem>>, vector<1x32xf32>
    %16 = vector.broadcast %15 : vector<1x32xf32> to vector<128x32xf32>
    %17 = arith.addf %14, %16 : vector<128x32xf32>
    %cst_16 = arith.constant 0.000000e+00 : f32
    %18 = vector.broadcast %cst_16 : f32 to vector<128x32xf32>
    %19 = arith.maximumf %17, %18 : vector<128x32xf32>
    %c0_17 = arith.constant 0 : index
    %c0_18 = arith.constant 0 : index
    %20 = vector.load %arg8[%c0_17, %c0_18] : memref<1x32xbf16, #tpu.memory_space<vmem>>, vector<1x32xbf16>
    %21 = arith.truncf %19 : vector<128x32xf32> to vector<128x32xbf16>
    %cst_19 = arith.constant dense<0.000000e+00> : vector<1x128xf32>
    %22 = tpu.matmul %20, %21, %cst_19 {dimension_numbers = #tpu.dot_dimension_numbers<[1], [1], [0], [0], [0, 0, 1, 0], [], []>} : vector<1x32xbf16>, vector<128x32xbf16>, vector<1x128xf32> -> vector<1x128xf32>
    %c0_20 = arith.constant 0 : index
    %c0_21 = arith.constant 0 : index
    %23 = vector.load %arg9[%c0_20, %c0_21] : memref<1x1xf32, #tpu.memory_space<vmem>>, vector<1x1xf32>
    %24 = vector.broadcast %23 : vector<1x1xf32> to vector<1x128xf32>
    %25 = arith.addf %22, %24 : vector<1x128xf32>
    %26 = vector.shape_cast %25 : vector<1x128xf32> to vector<1x1x128xf32>
    %c0_22 = arith.constant 0 : index
    %c0_23 = arith.constant 0 : index
    %c0_24 = arith.constant 0 : index
    %27 = vector.load %arg10[%c0_22, %c0_23, %c0_24] : memref<1x1x128xf32, #tpu.memory_space<vmem>>, vector<1x1x128xf32>
    tpu.vector_store %arg10[%c0_22, %c0_23, %c0_24], %26 {strides = array<i32>} : memref<1x1x128xf32, #tpu.memory_space<vmem>>, vector<1x1x128xf32>,
    return
  }
  func.func @transform_0(%arg0: i32) -> (i32, i32) {
    %c0_i32 = arith.constant 0 : i32
    %c0_i32_0 = arith.constant 0 : i32
    return %arg0, %c0_i32 : i32, i32
  }
  func.func @transform_1(%arg0: i32) -> (i32, i32) {
    %c0_i32 = arith.constant 0 : i32
    %c0_i32_0 = arith.constant 0 : i32
    return %arg0, %c0_i32 : i32, i32
  }
  func.func @transform_2(%arg0: i32) -> (i32, i32) {
    %c0_i32 = arith.constant 0 : i32
    %c0_i32_0 = arith.constant 0 : i32
    %c0_i32_1 = arith.constant 0 : i32
    return %c0_i32, %c0_i32_0 : i32, i32
  }
  func.func @transform_3(%arg0: i32) -> (i32, i32) {
    %c0_i32 = arith.constant 0 : i32
    %c0_i32_0 = arith.constant 0 : i32
    %c0_i32_1 = arith.constant 0 : i32
    return %c0_i32, %c0_i32_0 : i32, i32
  }
  func.func @transform_4(%arg0: i32) -> (i32, i32) {
    %c0_i32 = arith.constant 0 : i32
    %c0_i32_0 = arith.constant 0 : i32
    %c0_i32_1 = arith.constant 0 : i32
    return %c0_i32, %c0_i32_0 : i32, i32
  }
  func.func @transform_5(%arg0: i32) -> (i32, i32) {
    %c0_i32 = arith.constant 0 : i32
    %c0_i32_0 = arith.constant 0 : i32
    %c0_i32_1 = arith.constant 0 : i32
    return %c0_i32, %c0_i32_0 : i32, i32
  }
  func.func @transform_6(%arg0: i32) -> (i32, i32) {
    %c0_i32 = arith.constant 0 : i32
    %c0_i32_0 = arith.constant 0 : i32
    %c0_i32_1 = arith.constant 0 : i32
    return %c0_i32, %c0_i32_0 : i32, i32
  }
  func.func @transform_7(%arg0: i32) -> (i32, i32) {
    %c0_i32 = arith.constant 0 : i32
    %c0_i32_0 = arith.constant 0 : i32
    %c0_i32_1 = arith.constant 0 : i32
    return %c0_i32, %c0_i32_0 : i32, i32
  }
  func.func @transform_8(%arg0: i32) -> (i32, i32) {
    %c0_i32 = arith.constant 0 : i32
    %c0_i32_0 = arith.constant 0 : i32
    %c0_i32_1 = arith.constant 0 : i32
    return %c0_i32, %c0_i32_0 : i32, i32
  }
  func.func @transform_9(%arg0: i32) -> (i32, i32, i32) {
    %c0_i32 = arith.constant 0 : i32
    %c0_i32_0 = arith.constant 0 : i32
    %c0_i32_1 = arith.constant 0 : i32
    return %arg0, %c0_i32, %c0_i32_0 : i32, i32, i32
  }
}

</mosaic_0001>

<bundles_post_ra>
// kernel: ccnn_fc_forward.1
= control target key start
LH: loop header
LB: loop body
LE: loop exit
PB: predicated region body
PF: predicated region fallthrough
CT: control target
= control target key end

     0   :  { %vm346_vm0 = vcmask 1044480   ;;  %vm347_vm1 = vcmask 1045504   ;;  %v969_v1 = vmov 65535   ;;  %vm329_vm2 = vcmask 89088   ;;  %s1511_s2 = inlined_call_operand.vmem [shape: bf16[128,64], index: 2, kind: input, shape index: {}]   ;;  %s1512_s3 = inlined_call_operand.vmem [shape: bf16[11,64], index: 3, kind: input, shape index: {}]   ;;  %s1513_s1 = inlined_call_operand.vmem [shape: bf16[2,11], index: 1, kind: input, shape index: {}]   ;;  %s1514_s0 = inlined_call_operand.vmem [shape: bf16[2,128], index: 0, kind: input, shape index: {}]   ;;  %s1515_s4 = inlined_call_operand.vmem [shape: f32[1,64], index: 4, kind: input, shape index: {}]   ;;  %s1516_s5 = inlined_call_operand.vmem [shape: bf16[64,32], index: 5, kind: input, shape index: {}]   ;;  %s1517_s6 = inlined_call_operand.vmem [shape: f32[1,32], index: 6, kind: input, shape index: {}]   ;;  %s1518_s8 = inlined_call_operand.<no memory space> [shape: f32[1,1], index: 8, kind: input, shape index: {}]   ;;  %s1519_s7 = inlined_call_operand.vmem [shape: bf16[1,32], index: 7, kind: input, shape index: {}]   ;;  %s1520_s9 = inlined_call_operand.vmem [shape: f32[1,1,128], index: 9, kind: output, shape index: {}]  }
   0x1   :  { %v958_v0 = vld [vmem:[%s1511_s2 + $0x38] sm:$0xff]  ;;  %v348_v2 = vsel %vm346_vm0, 4294967295, %v969_v1  ;;  %v884_v3 = vld [vmem:[%s1512_s3] sm:$0xf]  ;;  %v957_v4 = vld [vmem:[%s1511_s2 + $0x30] sm:$0xff]  ;;  %vm730_vm3 = vcmask 523264  }
   0x2   :  { %601 = vmatpush.bf16.msra.mxu1 %v958_v0  ;;  %v959_v5 = vld [vmem:[%s1512_s3] sm:$0x30]  ;;  %v349_v6 = vsel %vm347_vm1, %v348_v2, 0  ;;  %v115_v7 = vld [vmem:[%s1513_s1] sm:$0x1]  ;;  %v956_v13 = vld [vmem:[%s1511_s2 + $0x28] sm:$0xff] }
   0x3   :  { %v885_v8 = vor.u32 %v959_v5, %v884_v3  ;;  %v116_v9 = vld [vmem:[%s1513_s1 + $0x1] sm:$0x1]  ;;  %v117_v10 = vld [vmem:[%s1513_s1 + $0x2] sm:$0x1]  ;;  %v118_v12 = vld [vmem:[%s1513_s1 + $0x3] sm:$0x1] }
   0x4   :  { %182 = vst [vmem:[#allocation1] ss:$9 sm:$0xff] %v115_v7  ;;  %v119_v14 = vld [vmem:[%s1513_s1 + $0x4] sm:$0x1]  ;;  %v120_v15 = vld [vmem:[%s1513_s1 + $0x5] sm:$0x1] }
   0x5   :  { %v351_v11 = vand.u32 %v885_v8, %v349_v6  ;;  %185 = vst [vmem:[#allocation1 + $0x1] ss:$9 sm:$0xff] %v116_v9  ;;  %v121_v16 = vld [vmem:[%s1513_s1 + $0x6] sm:$0x1]  ;;  %v122_v17 = vld [vmem:[%s1513_s1 + $0x7] sm:$0x1] }
   0x6   :  { %602 = vmatpush.bf16.msra.mxu1 %v957_v4  ;;  %188 = vst [vmem:[#allocation1 + $0x2] ss:$9 sm:$0xff] %v117_v10  ;;  %v955_v18 = vld [vmem:[%s1511_s2 + $0x20] sm:$0xff]  ;;  %v954_v19 = vld [vmem:[%s1511_s2 + $0x18] sm:$0xff]  ;;  %v953_v20 = vld [vmem:[%s1511_s2 + $0x10] sm:$0xff]  ;;  %vm836_vm4 = vcmask 261120  }
   0x7   :  { %360 = vmatpush.bf16.msra.mxu0 %v351_v11  ;;  %191 = vst [vmem:[#allocation1 + $0x3] ss:$9 sm:$0xff] %v118_v12  ;;  %v952_v22 = vld [vmem:[%s1511_s2 + $0x8] sm:$0xff]  ;;  %v951_v23 = vld [vmem:[%s1511_s2] sm:$0xff]  ;;  %v131_v32 = vld [vmem:[%s1513_s1 + $0x10] sm:$0x1] }
   0x8   :  { %194 = vst [vmem:[#allocation1 + $0x4] ss:$9 sm:$0xff] %v119_v14  ;;  %v123_v24 = vld [vmem:[%s1513_s1 + $0x8] sm:$0x1]  ;;  %v124_v25 = vld [vmem:[%s1513_s1 + $0x9] sm:$0x1] }
   0x9   :  { %197 = vst [vmem:[#allocation1 + $0x5] ss:$9 sm:$0xff] %v120_v15  ;;  %v125_v26 = vld [vmem:[%s1513_s1 + $0xa] sm:$0x1]  ;;  %v126_v27 = vld [vmem:[%s1513_s1 + $0xb] sm:$0x1] }
   0xa   :  { %603 = vmatpush.bf16.msra.mxu1 %v956_v13  ;;  %200 = vst [vmem:[#allocation1 + $0x6] ss:$9 sm:$0xff] %v121_v16  ;;  %v127_v28 = vld [vmem:[%s1513_s1 + $0xc] sm:$0x1]  ;;  %v128_v29 = vld [vmem:[%s1513_s1 + $0xd] sm:$0x1] }
   0xb   :  { %203 = vst [vmem:[#allocation1 + $0x7] ss:$9 sm:$0xff] %v122_v17  ;;  %v129_v30 = vld [vmem:[%s1513_s1 + $0xe] sm:$0x1]  ;;  %v130_v31 = vld [vmem:[%s1513_s1 + $0xf] sm:$0x1] }
   0xc   :  { %v132_v33 = vld [vmem:[%s1513_s1 + $0x11] sm:$0x1]  ;;  %v133_v34 = vld [vmem:[%s1513_s1 + $0x12] sm:$0x1]  ;;  %v134_v36 = vld [vmem:[%s1513_s1 + $0x13] sm:$0x1] }
   0xd   :  { %v135_v37 = vld [vmem:[%s1513_s1 + $0x14] sm:$0x1]  ;;  %v136_v38 = vld [vmem:[%s1513_s1 + $0x15] sm:$0x1]  ;;  %v137_v39 = vld [vmem:[%s1513_s1 + $0x16] sm:$0x1] }
   0xe   :  { %604 = vmatpush.bf16.msra.mxu1 %v955_v18  ;;  %v138_v40 = vld [vmem:[%s1513_s1 + $0x17] sm:$0x1]  ;;  %v139_v41 = vld [vmem:[%s1513_s1 + $0x18] sm:$0x1]  ;;  %v140_v42 = vld [vmem:[%s1513_s1 + $0x19] sm:$0x1] }
   0xf   :  { %v141_v43 = vld [vmem:[%s1513_s1 + $0x1a] sm:$0x1]  ;;  %v142_v45 = vld [vmem:[%s1513_s1 + $0x1b] sm:$0x1]  ;;  %v143_v46 = vld [vmem:[%s1513_s1 + $0x1c] sm:$0x1] }
  0x10   :  { %v144_v47 = vld [vmem:[%s1513_s1 + $0x1d] sm:$0x1]  ;;  %v145_v48 = vld [vmem:[%s1513_s1 + $0x1e] sm:$0x1]  ;;  %v146_v49 = vld [vmem:[%s1513_s1 + $0x1f] sm:$0x1] }
  0x11   :  { %v147_v50 = vld [vmem:[%s1513_s1 + $0x20] sm:$0x1]  ;;  %v148_v51 = vld [vmem:[%s1513_s1 + $0x21] sm:$0x1]  ;;  %v149_v52 = vld [vmem:[%s1513_s1 + $0x22] sm:$0x1] }
  0x12   :  { %605 = vmatpush.bf16.msra.mxu1 %v954_v19  ;;  %v204_v21 = vld [vmem:[#allocation1] sm:$0xff]  ;;  %v155_v59 = vld [vmem:[%s1513_s1 + $0x28] sm:$0x1]  ;;  %v156_v60 = vld [vmem:[%s1513_s1 + $0x29] sm:$0x1] }
  0x13   :  { %886 = vmatmul.msk.bf16.vlgmr.msra.gmra.mxu0 %vm329_vm2, %v204_v21  ;;  %206 = vst [vmem:[#allocation1] ss:$9 sm:$0xff] %v123_v24  ;;  %v150_v54 = vld [vmem:[%s1513_s1 + $0x23] sm:$0x1]  ;;  %v151_v55 = vld [vmem:[%s1513_s1 + $0x24] sm:$0x1] }
  0x14   :  { %208 = vst [vmem:[#allocation1 + $0x1] ss:$9 sm:$0xff] %v124_v25  ;;  %v152_v56 = vld [vmem:[%s1513_s1 + $0x25] sm:$0x1]  ;;  %v153_v57 = vld [vmem:[%s1513_s1 + $0x26] sm:$0x1] }
  0x15   :  { %210 = vst [vmem:[#allocation1 + $0x2] ss:$9 sm:$0xff] %v125_v26  ;;  %v154_v58 = vld [vmem:[%s1513_s1 + $0x27] sm:$0x1]  ;;  %v157_v61 = vld [vmem:[%s1513_s1 + $0x2a] sm:$0x1] }
  0x16   :  { %606 = vmatpush.bf16.msra.mxu1 %v953_v20  ;;  %212 = vst [vmem:[#allocation1 + $0x3] ss:$9 sm:$0xff] %v126_v27  ;;  %v158_v63 = vld [vmem:[%s1513_s1 + $0x2b] sm:$0x1]  ;;  %v159_v0 = vld [vmem:[%s1513_s1 + $0x2c] sm:$0x1] }
  0x17   :  { %214 = vst [vmem:[#allocation1 + $0x4] ss:$9 sm:$0xff] %v127_v28  ;;  %v160_v1 = vld [vmem:[%s1513_s1 + $0x2d] sm:$0x1]  ;;  %v161_v2 = vld [vmem:[%s1513_s1 + $0x2e] sm:$0x1] }
  0x18   :  { %216 = vst [vmem:[#allocation1 + $0x5] ss:$9 sm:$0xff] %v128_v29  ;;  %v162_v3 = vld [vmem:[%s1513_s1 + $0x2f] sm:$0x1]  ;;  %v163_v4 = vld [vmem:[%s1513_s1 + $0x30] sm:$0x1] }
  0x19   :  { %218 = vst [vmem:[#allocation1 + $0x6] ss:$9 sm:$0xff] %v129_v30  ;;  %v164_v5 = vld [vmem:[%s1513_s1 + $0x31] sm:$0x1]  ;;  %v165_v6 = vld [vmem:[%s1513_s1 + $0x32] sm:$0x1] }
  0x1a   :  { %607 = vmatpush.bf16.msra.mxu1 %v952_v22  ;;  %220 = vst [vmem:[#allocation1 + $0x7] ss:$9 sm:$0xff] %v130_v31  ;;  %v166_v8 = vld [vmem:[%s1513_s1 + $0x33] sm:$0x1]  ;;  %v167_v9 = vld [vmem:[%s1513_s1 + $0x34] sm:$0x1] }
  0x1b   :  { %v168_v10 = vld [vmem:[%s1513_s1 + $0x35] sm:$0x1]  ;;  %v169_v11 = vld [vmem:[%s1513_s1 + $0x36] sm:$0x1]  ;;  %v170_v12 = vld [vmem:[%s1513_s1 + $0x37] sm:$0x1] }
  0x1c   :  { %v171_v13 = vld [vmem:[%s1513_s1 + $0x38] sm:$0x1]  ;;  %v172_v14 = vld [vmem:[%s1513_s1 + $0x39] sm:$0x1]  ;;  %v173_v15 = vld [vmem:[%s1513_s1 + $0x3a] sm:$0x1] }
  0x1d   :  { %v174_v17 = vld [vmem:[%s1513_s1 + $0x3b] sm:$0x1]  ;;  %v175_v18 = vld [vmem:[%s1513_s1 + $0x3c] sm:$0x1]  ;;  %v176_v19 = vld [vmem:[%s1513_s1 + $0x3d] sm:$0x1] }
  0x1e   :  { %608 = vmatpush.bf16.msra.mxu1 %v951_v23  ;;  %v177_v20 = vld [vmem:[%s1513_s1 + $0x3e] sm:$0x1]  ;;  %v178_v21 = vld [vmem:[%s1513_s1 + $0x3f] sm:$0x1]  ;;  %v35_v22 = vld [vmem:[%s1514_s0] sm:$0x1] }
  0x1f   :  { %v36_v23 = vld [vmem:[%s1514_s0 + $0x1] sm:$0x1]  ;;  %v37_v24 = vld [vmem:[%s1514_s0 + $0x2] sm:$0x1]  ;;  %v38_v26 = vld [vmem:[%s1514_s0 + $0x3] sm:$0x1] }
  0x20   :  { %v39_v27 = vld [vmem:[%s1514_s0 + $0x4] sm:$0x1]  ;;  %v40_v28 = vld [vmem:[%s1514_s0 + $0x5] sm:$0x1]  ;;  %v41_v29 = vld [vmem:[%s1514_s0 + $0x6] sm:$0x1] }
  0x21   :  { %v221_v35 = vld [vmem:[#allocation1] sm:$0xff]  ;;  %v43_v31 = vld [vmem:[%s1514_s0 + $0x8] sm:$0x1] }
  0x22   :  { %223 = vst [vmem:[#allocation1] ss:$9 sm:$0xff] %v131_v32  ;;  %v42_v30 = vld [vmem:[%s1514_s0 + $0x7] sm:$0x1]  ;;  %v44_v32 = vld [vmem:[%s1514_s0 + $0x9] sm:$0x1] }
  0x23   :  { %887 = vmatmul.msk.bf16.gmra.mxu0 %vm329_vm2, %v221_v35  ;;  %225 = vst [vmem:[#allocation1 + $0x1] ss:$9 sm:$0xff] %v132_v33  ;;  %v46_v35 = vld [vmem:[%s1514_s0 + $0xb] sm:$0x1] }
  0x24   :  { %227 = vst [vmem:[#allocation1 + $0x2] ss:$9 sm:$0xff] %v133_v34  ;;  %v45_v34 = vld [vmem:[%s1514_s0 + $0xa] sm:$0x1] }
  0x25   :  { %229 = vst [vmem:[#allocation1 + $0x3] ss:$9 sm:$0xff] %v134_v36  ;;  %v47_v36 = vld [vmem:[%s1514_s0 + $0xc] sm:$0x1] }
  0x26   :  { %231 = vst [vmem:[#allocation1 + $0x4] ss:$9 sm:$0xff] %v135_v37  ;;  %v48_v37 = vld [vmem:[%s1514_s0 + $0xd] sm:$0x1] }
  0x27   :  { %233 = vst [vmem:[#allocation1 + $0x5] ss:$9 sm:$0xff] %v136_v38  ;;  %v49_v38 = vld [vmem:[%s1514_s0 + $0xe] sm:$0x1] }
  0x28   :  { %235 = vst [vmem:[#allocation1 + $0x6] ss:$9 sm:$0xff] %v137_v39  ;;  %v50_v39 = vld [vmem:[%s1514_s0 + $0xf] sm:$0x1] }
  0x29   :  { %237 = vst [vmem:[#allocation1 + $0x7] ss:$9 sm:$0xff] %v138_v40  ;;  %v51_v40 = vld [vmem:[%s1514_s0 + $0x10] sm:$0x1] }
  0x30   :  { %v238_v44 = vld [vmem:[#allocation1] sm:$0xff] }
  0x31   :  { %240 = vst [vmem:[#allocation1] ss:$9 sm:$0xff] %v139_v41  ;;  %v52_v41 = vld [vmem:[%s1514_s0 + $0x11] sm:$0x1] }
  0x32   :  { %242 = vst [vmem:[#allocation1 + $0x1] ss:$9 sm:$0xff] %v140_v42 }
  0x33   :  { %888 = vmatmul.msk.bf16.gmra.mxu0 %vm329_vm2, %v238_v44  ;;  %244 = vst [vmem:[#allocation1 + $0x2] ss:$9 sm:$0xff] %v141_v43  ;;  %v53_v43 = vld [vmem:[%s1514_s0 + $0x12] sm:$0x1]  ;;  %v54_v44 = vld [vmem:[%s1514_s0 + $0x13] sm:$0x1] }
  0x34   :  { %246 = vst [vmem:[#allocation1 + $0x3] ss:$9 sm:$0xff] %v142_v45  ;;  %v55_v45 = vld [vmem:[%s1514_s0 + $0x14] sm:$0x1] }
  0x35   :  { %248 = vst [vmem:[#allocation1 + $0x4] ss:$9 sm:$0xff] %v143_v46  ;;  %v56_v46 = vld [vmem:[%s1514_s0 + $0x15] sm:$0x1] }
  0x36   :  { %250 = vst [vmem:[#allocation1 + $0x5] ss:$9 sm:$0xff] %v144_v47  ;;  %v57_v47 = vld [vmem:[%s1514_s0 + $0x16] sm:$0x1] }
  0x37   :  { %252 = vst [vmem:[#allocation1 + $0x6] ss:$9 sm:$0xff] %v145_v48  ;;  %v58_v48 = vld [vmem:[%s1514_s0 + $0x17] sm:$0x1] }
  0x38   :  { %254 = vst [vmem:[#allocation1 + $0x7] ss:$9 sm:$0xff] %v146_v49  ;;  %v59_v49 = vld [vmem:[%s1514_s0 + $0x18] sm:$0x1] }
  0x3f   :  { %v255_v53 = vld [vmem:[#allocation1] sm:$0xff] }
  0x40   :  { %257 = vst [vmem:[#allocation1] ss:$9 sm:$0xff] %v147_v50  ;;  %v60_v50 = vld [vmem:[%s1514_s0 + $0x19] sm:$0x1] }
  0x41   :  { %259 = vst [vmem:[#allocation1 + $0x1] ss:$9 sm:$0xff] %v148_v51 }
  0x42   :  { %261 = vst [vmem:[#allocation1 + $0x2] ss:$9 sm:$0xff] %v149_v52  ;;  %v61_v52 = vld [vmem:[%s1514_s0 + $0x1a] sm:$0x1] }
  0x43   :  { %889 = vmatmul.msk.bf16.gmra.mxu0 %vm329_vm2, %v255_v53  ;;  %263 = vst [vmem:[#allocation1 + $0x3] ss:$9 sm:$0xff] %v150_v54  ;;  %v62_v53 = vld [vmem:[%s1514_s0 + $0x1b] sm:$0x1]  ;;  %v63_v54 = vld [vmem:[%s1514_s0 + $0x1c] sm:$0x1] }
  0x44   :  { %265 = vst [vmem:[#allocation1 + $0x4] ss:$9 sm:$0xff] %v151_v55  ;;  %v64_v55 = vld [vmem:[%s1514_s0 + $0x1d] sm:$0x1] }
  0x45   :  { %267 = vst [vmem:[#allocation1 + $0x5] ss:$9 sm:$0xff] %v152_v56  ;;  %v65_v56 = vld [vmem:[%s1514_s0 + $0x1e] sm:$0x1] }
  0x46   :  { %269 = vst [vmem:[#allocation1 + $0x6] ss:$9 sm:$0xff] %v153_v57  ;;  %v66_v57 = vld [vmem:[%s1514_s0 + $0x1f] sm:$0x1] }
  0x47   :  { %271 = vst [vmem:[#allocation1 + $0x7] ss:$9 sm:$0xff] %v154_v58  ;;  %v67_v58 = vld [vmem:[%s1514_s0 + $0x20] sm:$0x1] }
  0x4e   :  { %v272_v62 = vld [vmem:[#allocation1] sm:$0xff] }
  0x4f   :  { %274 = vst [vmem:[#allocation1] ss:$9 sm:$0xff] %v155_v59  ;;  %v68_v59 = vld [vmem:[%s1514_s0 + $0x21] sm:$0x1] }
  0x50   :  { %276 = vst [vmem:[#allocation1 + $0x1] ss:$9 sm:$0xff] %v156_v60 }
  0x51   :  { %278 = vst [vmem:[#allocation1 + $0x2] ss:$9 sm:$0xff] %v157_v61  ;;  %v69_v61 = vld [vmem:[%s1514_s0 + $0x22] sm:$0x1] }
  0x52   :  { %280 = vst [vmem:[#allocation1 + $0x3] ss:$9 sm:$0xff] %v158_v63  ;;  %v71_v63 = vld [vmem:[%s1514_s0 + $0x24] sm:$0x1] }
  0x53   :  { %890 = vmatmul.msk.bf16.gmra.mxu0 %vm329_vm2, %v272_v62  ;;  %282 = vst [vmem:[#allocation1 + $0x4] ss:$9 sm:$0xff] %v159_v0  ;;  %v70_v62 = vld [vmem:[%s1514_s0 + $0x23] sm:$0x1]  ;;  %v72_v0 = vld [vmem:[%s1514_s0 + $0x25] sm:$0x1] }
  0x54   :  { %284 = vst [vmem:[#allocation1 + $0x5] ss:$9 sm:$0xff] %v160_v1  ;;  %v73_v1 = vld [vmem:[%s1514_s0 + $0x26] sm:$0x1] }
  0x55   :  { %286 = vst [vmem:[#allocation1 + $0x6] ss:$9 sm:$0xff] %v161_v2  ;;  %v74_v2 = vld [vmem:[%s1514_s0 + $0x27] sm:$0x1] }
  0x56   :  { %288 = vst [vmem:[#allocation1 + $0x7] ss:$9 sm:$0xff] %v162_v3  ;;  %v75_v3 = vld [vmem:[%s1514_s0 + $0x28] sm:$0x1] }
  0x5d   :  { %v289_v7 = vld [vmem:[#allocation1] sm:$0xff] }
  0x5e   :  { %291 = vst [vmem:[#allocation1] ss:$9 sm:$0xff] %v163_v4  ;;  %v76_v4 = vld [vmem:[%s1514_s0 + $0x29] sm:$0x1] }
  0x5f   :  { %293 = vst [vmem:[#allocation1 + $0x1] ss:$9 sm:$0xff] %v164_v5 }
  0x60   :  { %295 = vst [vmem:[#allocation1 + $0x2] ss:$9 sm:$0xff] %v165_v6  ;;  %v77_v6 = vld [vmem:[%s1514_s0 + $0x2a] sm:$0x1] }
  0x61   :  { %297 = vst [vmem:[#allocation1 + $0x3] ss:$9 sm:$0xff] %v166_v8  ;;  %v79_v8 = vld [vmem:[%s1514_s0 + $0x2c] sm:$0x1] }
  0x62   :  { %299 = vst [vmem:[#allocation1 + $0x4] ss:$9 sm:$0xff] %v167_v9  ;;  %v80_v9 = vld [vmem:[%s1514_s0 + $0x2d] sm:$0x1] }
  0x63   :  { %891 = vmatmul.msk.bf16.gmra.mxu0 %vm329_vm2, %v289_v7  ;;  %301 = vst [vmem:[#allocation1 + $0x5] ss:$9 sm:$0xff] %v168_v10  ;;  %v78_v7 = vld [vmem:[%s1514_s0 + $0x2b] sm:$0x1]  ;;  %v81_v10 = vld [vmem:[%s1514_s0 + $0x2e] sm:$0x1] }
  0x64   :  { %303 = vst [vmem:[#allocation1 + $0x6] ss:$9 sm:$0xff] %v169_v11  ;;  %v82_v11 = vld [vmem:[%s1514_s0 + $0x2f] sm:$0x1] }
  0x65   :  { %305 = vst [vmem:[#allocation1 + $0x7] ss:$9 sm:$0xff] %v170_v12  ;;  %v83_v12 = vld [vmem:[%s1514_s0 + $0x30] sm:$0x1] }
  0x6c   :  { %v306_v16 = vld [vmem:[#allocation1] sm:$0xff] }
  0x6d   :  { %308 = vst [vmem:[#allocation1] ss:$9 sm:$0xff] %v171_v13  ;;  %v84_v13 = vld [vmem:[%s1514_s0 + $0x31] sm:$0x1] }
  0x6e   :  { %310 = vst [vmem:[#allocation1 + $0x1] ss:$9 sm:$0xff] %v172_v14 }
  0x6f   :  { %312 = vst [vmem:[#allocation1 + $0x2] ss:$9 sm:$0xff] %v173_v15  ;;  %v85_v15 = vld [vmem:[%s1514_s0 + $0x32] sm:$0x1] }
  0x70   :  { %314 = vst [vmem:[#allocation1 + $0x3] ss:$9 sm:$0xff] %v174_v17  ;;  %v87_v17 = vld [vmem:[%s1514_s0 + $0x34] sm:$0x1] }
  0x71   :  { %316 = vst [vmem:[#allocation1 + $0x4] ss:$9 sm:$0xff] %v175_v18  ;;  %v88_v18 = vld [vmem:[%s1514_s0 + $0x35] sm:$0x1] }
  0x72   :  { %318 = vst [vmem:[#allocation1 + $0x5] ss:$9 sm:$0xff] %v176_v19  ;;  %v89_v19 = vld [vmem:[%s1514_s0 + $0x36] sm:$0x1] }
  0x73   :  { %892 = vmatmul.msk.bf16.gmra.mxu0 %vm329_vm2, %v306_v16  ;;  %320 = vst [vmem:[#allocation1 + $0x6] ss:$9 sm:$0xff] %v177_v20  ;;  %v86_v16 = vld [vmem:[%s1514_s0 + $0x33] sm:$0x1]  ;;  %v90_v20 = vld [vmem:[%s1514_s0 + $0x37] sm:$0x1] }
  0x74   :  { %322 = vst [vmem:[#allocation1 + $0x7] ss:$9 sm:$0xff] %v178_v21  ;;  %v91_v21 = vld [vmem:[%s1514_s0 + $0x38] sm:$0x1] }
  0x7b   :  { %v323_v25 = vld [vmem:[#allocation1] sm:$0xff] }
  0x7c   :  { %403 = vst [vmem:[#allocation1] ss:$9 sm:$0xff] %v35_v22  ;;  %v92_v22 = vld [vmem:[%s1514_s0 + $0x39] sm:$0x1] }
  0x7d   :  { %406 = vst [vmem:[#allocation1 + $0x1] ss:$9 sm:$0xff] %v36_v23 }
  0x7e   :  { %409 = vst [vmem:[#allocation1 + $0x2] ss:$9 sm:$0xff] %v37_v24  ;;  %v93_v24 = vld [vmem:[%s1514_s0 + $0x3a] sm:$0x1] }
  0x7f   :  { %412 = vst [vmem:[#allocation1 + $0x3] ss:$9 sm:$0xff] %v38_v26  ;;  %v95_v26 = vld [vmem:[%s1514_s0 + $0x3c] sm:$0x1] }
  0x80   :  { %415 = vst [vmem:[#allocation1 + $0x4] ss:$9 sm:$0xff] %v39_v27  ;;  %v96_v27 = vld [vmem:[%s1514_s0 + $0x3d] sm:$0x1] }
  0x81   :  { %418 = vst [vmem:[#allocation1 + $0x5] ss:$9 sm:$0xff] %v40_v28  ;;  %v97_v28 = vld [vmem:[%s1514_s0 + $0x3e] sm:$0x1] }
  0x82   :  { %421 = vst [vmem:[#allocation1 + $0x6] ss:$9 sm:$0xff] %v41_v29  ;;  %v963_v29 = vld [vmem:[%s1516_s5 + $0x18] sm:$0xff] }
  0x83   :  { %893 = vmatmul.msk.bf16.gmra.mxu0 %vm329_vm2, %v323_v25  ;;  %424 = vst [vmem:[#allocation1 + $0x7] ss:$9 sm:$0xff] %v42_v30  ;;  %v94_v25 = vld [vmem:[%s1514_s0 + $0x3b] sm:$0x1]  ;;  %v98_v30 = vld [vmem:[%s1514_s0 + $0x3f] sm:$0x1]  ;;  %759 = vmatpush.bf16.msra.mxu2 %v963_v29 }
  0x8a   :  { %v425_v33 = vld [vmem:[#allocation1] sm:$0xff] }
  0x8b   :  { %609 = vmatmul.bf16.vlgmr.msra.gmra.mxu1 %v425_v33  ;;  %427 = vst [vmem:[#allocation1] ss:$9 sm:$0xff] %v43_v31  ;;  %v961_v33 = vld [vmem:[%s1516_s5 + $0x8] sm:$0xff] }
  0x8c   :  { %429 = vst [vmem:[#allocation1 + $0x1] ss:$9 sm:$0xff] %v44_v32  ;;  %v962_v32 = vld [vmem:[%s1516_s5 + $0x10] sm:$0xff] }
  0x8d   :  { %431 = vst [vmem:[#allocation1 + $0x2] ss:$9 sm:$0xff] %v45_v34  ;;  %760 = vmatpush.bf16.msra.mxu2 %v962_v32 }
  0x8e   :  { %433 = vst [vmem:[#allocation1 + $0x3] ss:$9 sm:$0xff] %v46_v35  ;;  %v960_v35 = vld [vmem:[%s1516_s5] sm:$0xff] }
  0x8f   :  { %435 = vst [vmem:[#allocation1 + $0x4] ss:$9 sm:$0xff] %v47_v36 }
  0x90   :  { %437 = vst [vmem:[#allocation1 + $0x5] ss:$9 sm:$0xff] %v48_v37  ;;  %v362_v31 = vpop.f32.mrf.mxu0 }
  0x91   :  { %439 = vst [vmem:[#allocation1 + $0x6] ss:$9 sm:$0xff] %v49_v38  ;;  %761 = vmatpush.bf16.msra.mxu2 %v961_v33 }
  0x92   :  { %441 = vst [vmem:[#allocation1 + $0x7] ss:$9 sm:$0xff] %v50_v39 }
  0x95   :  { %762 = vmatpush.bf16.msra.mxu2 %v960_v35 }
  0x98   :  { %v364_v34 = vpop.f32.mrf.mxu0 }
  0x99   :  { %v442_v42 = vld [vmem:[#allocation1] sm:$0xff] }
  0x9a   :  { %444 = vst [vmem:[#allocation1] ss:$9 sm:$0xff] %v51_v40 }
  0x9b   :  { %614 = vmatmul.bf16.gmra.mxu1 %v442_v42  ;;  %446 = vst [vmem:[#allocation1 + $0x1] ss:$9 sm:$0xff] %v52_v41  ;;  %v1458_v41 = vld [vmem:[%s1515_s4] ss:$0 sm:$0xff] }
  0x9c   :  { %448 = vst [vmem:[#allocation1 + $0x2] ss:$9 sm:$0xff] %v53_v43 }
  0x9d   :  { %450 = vst [vmem:[#allocation1 + $0x3] ss:$9 sm:$0xff] %v54_v44 }
  0x9e   :  { %452 = vst [vmem:[#allocation1 + $0x4] ss:$9 sm:$0xff] %v55_v45 }
  0x9f   :  { %454 = vst [vmem:[#allocation1 + $0x5] ss:$9 sm:$0xff] %v56_v46 }
  0xa0   :  { %456 = vst [vmem:[#allocation1 + $0x6] ss:$9 sm:$0xff] %v57_v47  ;;  %v367_v37 = vpop.f32.mrf.mxu0 }
  0xa1   :  { %458 = vst [vmem:[#allocation1 + $0x7] ss:$9 sm:$0xff] %v58_v48 }
  0xa8   :  { %v459_v51 = vld [vmem:[#allocation1] sm:$0xff]  ;;  %v369_v39 = vpop.f32.mrf.mxu0 }
  0xa9   :  { %461 = vst [vmem:[#allocation1] ss:$9 sm:$0xff] %v59_v49 }
  0xaa   :  { %463 = vst [vmem:[#allocation1 + $0x1] ss:$9 sm:$0xff] %v60_v50 }
  0xab   :  { %619 = vmatmul.bf16.gmra.mxu1 %v459_v51  ;;  %465 = vst [vmem:[#allocation1 + $0x2] ss:$9 sm:$0xff] %v61_v52 }
  0xac   :  { %467 = vst [vmem:[#allocation1 + $0x3] ss:$9 sm:$0xff] %v62_v53 }
  0xad   :  { %469 = vst [vmem:[#allocation1 + $0x4] ss:$9 sm:$0xff] %v63_v54 }
  0xae   :  { %471 = vst [vmem:[#allocation1 + $0x5] ss:$9 sm:$0xff] %v64_v55 }
  0xaf   :  { %473 = vst [vmem:[#allocation1 + $0x6] ss:$9 sm:$0xff] %v65_v56 }
  0xb0   :  { %475 = vst [vmem:[#allocation1 + $0x7] ss:$9 sm:$0xff] %v66_v57  ;;  %v372_v45 = vpop.f32.mrf.mxu0 }
  0xb7   :  { %v476_v60 = vld [vmem:[#allocation1] sm:$0xff] }
  0xb8   :  { %478 = vst [vmem:[#allocation1] ss:$9 sm:$0xff] %v67_v58  ;;  %v374_v51 = vpop.f32.mrf.mxu0 }
  0xb9   :  { %480 = vst [vmem:[#allocation1 + $0x1] ss:$9 sm:$0xff] %v68_v59 }
  0xba   :  { %482 = vst [vmem:[#allocation1 + $0x2] ss:$9 sm:$0xff] %v69_v61 }
  0xbb   :  { %624 = vmatmul.bf16.gmra.mxu1 %v476_v60  ;;  %484 = vst [vmem:[#allocation1 + $0x3] ss:$9 sm:$0xff] %v70_v62 }
  0xbc   :  { %486 = vst [vmem:[#allocation1 + $0x4] ss:$9 sm:$0xff] %v71_v63 }
  0xbd   :  { %488 = vst [vmem:[#allocation1 + $0x5] ss:$9 sm:$0xff] %v72_v0 }
  0xbe   :  { %490 = vst [vmem:[#allocation1 + $0x6] ss:$9 sm:$0xff] %v73_v1 }
  0xbf   :  { %492 = vst [vmem:[#allocation1 + $0x7] ss:$9 sm:$0xff] %v74_v2 }
  0xc0   :  { %v377_v59 = vpop.f32.mrf.mxu0 }
  0xc6   :  { %v493_v5 = vld [vmem:[#allocation1] sm:$0xff] }
  0xc7   :  { %495 = vst [vmem:[#allocation1] ss:$9 sm:$0xff] %v75_v3 }
  0xc8   :  { %497 = vst [vmem:[#allocation1 + $0x1] ss:$9 sm:$0xff] %v76_v4  ;;  %v379_v0 = vpop.f32.mrf.mxu0 }
  0xc9   :  { %499 = vst [vmem:[#allocation1 + $0x2] ss:$9 sm:$0xff] %v77_v6 }
  0xca   :  { %501 = vst [vmem:[#allocation1 + $0x3] ss:$9 sm:$0xff] %v78_v7 }
  0xcb   :  { %629 = vmatmul.bf16.gmra.mxu1 %v493_v5  ;;  %503 = vst [vmem:[#allocation1 + $0x4] ss:$9 sm:$0xff] %v79_v8 }
  0xcc   :  { %505 = vst [vmem:[#allocation1 + $0x5] ss:$9 sm:$0xff] %v80_v9 }
  0xcd   :  { %507 = vst [vmem:[#allocation1 + $0x6] ss:$9 sm:$0xff] %v81_v10 }
  0xce   :  { %509 = vst [vmem:[#allocation1 + $0x7] ss:$9 sm:$0xff] %v82_v11 }
  0xd0   :  { %v382_v8 = vpop.f32.mrf.mxu0 }
  0xd5   :  { %v510_v14 = vld [vmem:[#allocation1] sm:$0xff] }
  0xd6   :  { %512 = vst [vmem:[#allocation1] ss:$9 sm:$0xff] %v83_v12 }
  0xd7   :  { %514 = vst [vmem:[#allocation1 + $0x1] ss:$9 sm:$0xff] %v84_v13 }
  0xd8   :  { %516 = vst [vmem:[#allocation1 + $0x2] ss:$9 sm:$0xff] %v85_v15 }
  0xd9   :  { %518 = vst [vmem:[#allocation1 + $0x3] ss:$9 sm:$0xff] %v86_v16 }
  0xda   :  { %520 = vst [vmem:[#allocation1 + $0x4] ss:$9 sm:$0xff] %v87_v17 }
  0xdb   :  { %634 = vmatmul.bf16.gmra.mxu1 %v510_v14  ;;  %522 = vst [vmem:[#allocation1 + $0x5] ss:$9 sm:$0xff] %v88_v18  ;;  %v384_v14 = vpop.f32.mrf.mxu0 }
  0xdc   :  { %524 = vst [vmem:[#allocation1 + $0x6] ss:$9 sm:$0xff] %v89_v19 }
  0xdd   :  { %526 = vst [vmem:[#allocation1 + $0x7] ss:$9 sm:$0xff] %v90_v20 }
  0xe3   :  { %v387_v20 = vpop.f32.mrf.mxu0 }
  0xe4   :  { %v527_v23 = vld [vmem:[#allocation1] sm:$0xff] }
  0xe5   :  { %529 = vst [vmem:[#allocation1] ss:$9 sm:$0xff] %v91_v21 }
  0xe6   :  { %531 = vst [vmem:[#allocation1 + $0x1] ss:$9 sm:$0xff] %v92_v22 }
  0xe7   :  { %533 = vst [vmem:[#allocation1 + $0x2] ss:$9 sm:$0xff] %v93_v24 }
  0xe8   :  { %535 = vst [vmem:[#allocation1 + $0x3] ss:$9 sm:$0xff] %v94_v25 }
  0xe9   :  { %537 = vst [vmem:[#allocation1 + $0x4] ss:$9 sm:$0xff] %v95_v26 }
  0xea   :  { %539 = vst [vmem:[#allocation1 + $0x5] ss:$9 sm:$0xff] %v96_v27 }
  0xeb   :  { %639 = vmatmul.bf16.gmra.mxu1 %v527_v23  ;;  %541 = vst [vmem:[#allocation1 + $0x6] ss:$9 sm:$0xff] %v97_v28  ;;  %v389_v28 = vpop.f32.mrf.mxu0 }
  0xec   :  { %543 = vst [vmem:[#allocation1 + $0x7] ss:$9 sm:$0xff] %v98_v30 }
  0xf3   :  { %v544_v36 = vld [vmem:[#allocation1] sm:$0xff] }
  0xfb   :  { %644 = vmatmul.bf16.gmra.mxu1 %v544_v36 }
 0x108   :  { %v610_v38 = vpop.f32.mrf.mxu1 }
 0x109   :  { %v611_v40 = vadd.f32 %v610_v38, %v362_v31 }
 0x10b   :  { %v654_v43 = vadd.f32 %v1458_v41, %v611_v40 }
 0x10d   :  { %v670_v47 = vmax.f32 %v654_v43, 0.0 }
 0x110   :  { %v612_v42 = vpop.f32.mrf.mxu1 }
 0x111   :  { %v613_v44 = vadd.f32 %v612_v42, %v364_v34  ;;  %v392_v34 = vpop.f32.mrf.mxu0 }
 0x113   :  { %v655_v46 = vadd.f32 %v1458_v41, %v613_v44 }
 0x115   :  { %v671_v48 = vmax.f32 %v655_v46, 0.0 }
 0x117   :  { %v686_v49 = vpack.c.bf16 %v671_v48, %v670_v47 }
 0x118   :  { %v615_v50 = vpop.f32.mrf.mxu1 }
 0x119   :  { %942 = vmatmul.msk.bf16.vlgmr.msra.gmra.mxu2 %vm730_vm3, %v686_v49  ;;  %v616_v52 = vadd.f32 %v615_v50, %v367_v37  ;;  %v394_v40 = vpop.f32.mrf.mxu0 }
 0x11b   :  { %v656_v54 = vadd.f32 %v1458_v41, %v616_v52 }
 0x11d   :  { %v672_v57 = vmax.f32 %v656_v54, 0.0 }
 0x120   :  { %v617_v53 = vpop.f32.mrf.mxu1 }
 0x121   :  { %v618_v55 = vadd.f32 %v617_v53, %v369_v39  ;;  %v397_v49 = vpop.f32.mrf.mxu0 }
 0x123   :  { %v657_v56 = vadd.f32 %v1458_v41, %v618_v55 }
 0x125   :  { %v673_v58 = vmax.f32 %v657_v56, 0.0 }
 0x127   :  { %v687_v60 = vpack.c.bf16 %v673_v58, %v672_v57 }
 0x128   :  { %v620_v61 = vpop.f32.mrf.mxu1 }
 0x129   :  { %943 = vmatmul.msk.bf16.gmra.mxu2 %vm730_vm3, %v687_v60  ;;  %v621_v62 = vadd.f32 %v620_v61, %v372_v45  ;;  %v399_v53 = vpop.f32.mrf.mxu0 }
 0x12b   :  { %v658_v1 = vadd.f32 %v1458_v41, %v621_v62  ;;  %v968_v62 = vld [vmem:[%s1517_s6] ss:$0 sm:$0xff] }
 0x12d   :  { %v674_v4 = vmax.f32 %v658_v1, 0.0 }
 0x130   :  { %v622_v63 = vpop.f32.mrf.mxu1 }
 0x131   :  { %v623_v2 = vadd.f32 %v622_v63, %v374_v51 }
 0x133   :  { %v659_v3 = vadd.f32 %v1458_v41, %v623_v2 }
 0x135   :  { %v675_v5 = vmax.f32 %v659_v3, 0.0 }
 0x137   :  { %v688_v6 = vpack.c.bf16 %v675_v5, %v674_v4 }
 0x138   :  { %v625_v7 = vpop.f32.mrf.mxu1 }
 0x139   :  { %944 = vmatmul.msk.bf16.gmra.mxu2 %vm730_vm3, %v688_v6  ;;  %v626_v9 = vadd.f32 %v625_v7, %v377_v59 }
 0x13b   :  { %v660_v11 = vadd.f32 %v1458_v41, %v626_v9 }
 0x13d   :  { %v676_v15 = vmax.f32 %v660_v11, 0.0 }
 0x140   :  { %v627_v10 = vpop.f32.mrf.mxu1 }
 0x141   :  { %v628_v12 = vadd.f32 %v627_v10, %v379_v0 }
 0x143   :  { %v661_v13 = vadd.f32 %v1458_v41, %v628_v12 }
 0x145   :  { %v677_v16 = vmax.f32 %v661_v13, 0.0 }
 0x147   :  { %v689_v17 = vpack.c.bf16 %v677_v16, %v676_v15 }
 0x148   :  { %v630_v18 = vpop.f32.mrf.mxu1 }
 0x149   :  { %945 = vmatmul.msk.bf16.gmra.mxu2 %vm730_vm3, %v689_v17  ;;  %v631_v19 = vadd.f32 %v630_v18, %v382_v8 }
 0x14b   :  { %v662_v22 = vadd.f32 %v1458_v41, %v631_v19 }
 0x14d   :  { %v678_v25 = vmax.f32 %v662_v22, 0.0 }
 0x150   :  { %v632_v21 = vpop.f32.mrf.mxu1 }
 0x151   :  { %v633_v23 = vadd.f32 %v632_v21, %v384_v14 }
 0x153   :  { %v663_v24 = vadd.f32 %v1458_v41, %v633_v23 }
 0x155   :  { %v679_v26 = vmax.f32 %v663_v24, 0.0 }
 0x157   :  { %v690_v27 = vpack.c.bf16 %v679_v26, %v678_v25 }
 0x158   :  { %v635_v29 = vpop.f32.mrf.mxu1 }
 0x159   :  { %946 = vmatmul.msk.bf16.gmra.mxu2 %vm730_vm3, %v690_v27  ;;  %v636_v30 = vadd.f32 %v635_v29, %v387_v20 }
 0x15b   :  { %v664_v32 = vadd.f32 %v1458_v41, %v636_v30 }
 0x15d   :  { %v680_v36 = vmax.f32 %v664_v32, 0.0 }
 0x160   :  { %v637_v31 = vpop.f32.mrf.mxu1 }
 0x161   :  { %v638_v33 = vadd.f32 %v637_v31, %v389_v28 }
 0x163   :  { %v665_v35 = vadd.f32 %v1458_v41, %v638_v33 }
 0x165   :  { %v681_v37 = vmax.f32 %v665_v35, 0.0 }
 0x167   :  { %v691_v38 = vpack.c.bf16 %v681_v37, %v680_v36 }
 0x168   :  { %v640_v39 = vpop.f32.mrf.mxu1 }
 0x169   :  { %947 = vmatmul.msk.bf16.gmra.mxu2 %vm730_vm3, %v691_v38  ;;  %v641_v42 = vadd.f32 %v640_v39, %v392_v34 }
 0x16b   :  { %v666_v44 = vadd.f32 %v1458_v41, %v641_v42 }
 0x16d   :  { %v682_v47 = vmax.f32 %v666_v44, 0.0 }
 0x170   :  { %v642_v43 = vpop.f32.mrf.mxu1 }
 0x171   :  { %v643_v45 = vadd.f32 %v642_v43, %v394_v40 }
 0x173   :  { %v667_v46 = vadd.f32 %v1458_v41, %v643_v45 }
 0x175   :  { %v683_v48 = vmax.f32 %v667_v46, 0.0 }
 0x177   :  { %v692_v50 = vpack.c.bf16 %v683_v48, %v682_v47 }
 0x178   :  { %v645_v51 = vpop.f32.mrf.mxu1 }
 0x179   :  { %948 = vmatmul.msk.bf16.gmra.mxu2 %vm730_vm3, %v692_v50  ;;  %v646_v52 = vadd.f32 %v645_v51, %v397_v49 }
 0x17b   :  { %v668_v55 = vadd.f32 %v1458_v41, %v646_v52 }
 0x17d   :  { %v684_v58 = vmax.f32 %v668_v55, 0.0 }
 0x180   :  { %v647_v54 = vpop.f32.mrf.mxu1 }
 0x181   :  { %v648_v56 = vadd.f32 %v647_v54, %v399_v53 }
 0x183   :  { %v669_v57 = vadd.f32 %v1458_v41, %v648_v56 }
 0x185   :  { %v685_v59 = vmax.f32 %v669_v57, 0.0 }
 0x187   :  { %v693_v60 = vpack.c.bf16 %v685_v59, %v684_v58  ;;  %v14_v59 = vstv %s1518_s8 }
 0x188   :  { %15 = vst [vmem:[#allocation2] sm:$0x1] %v14_v59 }
 0x189   :  { %949 = vmatmul.msk.bf16.gmra.mxu2 %vm730_vm3, %v693_v60  ;;  %v970_v60 = vmov 0  }
 0x18a   :  { %966 = vset.pattern.permute.xlu0 %v970_v60 }
 0x19c   :  { %v764_v61 = vpop.f32.mrf.mxu2 }
 0x19d   :  { %v765_v63 = vadd.f32 %v968_v62, %v764_v61 }
 0x19f   :  { %v804_v2 = vmax.f32 %v765_v63, 0.0 }
 0x1a4   :  { %v766_v0 = vpop.f32.mrf.mxu2 }
 0x1a5   :  { %v767_v1 = vadd.f32 %v968_v62, %v766_v0 }
 0x1a7   :  { %v805_v3 = vmax.f32 %v767_v1, 0.0  ;;  %v820_v1 = vld [vmem:[%s1519_s7] sm:$0x1] }
 0x1a9   :  { %v1487_v4 = vpack.c.bf16 %v805_v3, %v804_v2 }
 0x1ab   :  { %v841_v0 = vsel %vm836_vm4, %v1487_v4, 0 }
 0x1ac   :  { %v769_v5 = vpop.f32.mrf.mxu2 }
 0x1ad   :  { %v770_v6 = vadd.f32 %v968_v62, %v769_v5 }
 0x1af   :  { %v806_v8 = vmax.f32 %v770_v6, 0.0 }
 0x1b4   :  { %v771_v41 = vpop.f32.mrf.mxu2 }
 0x1b5   :  { %v772_v7 = vadd.f32 %v968_v62, %v771_v41 }
 0x1b7   :  { %v807_v9 = vmax.f32 %v772_v7, 0.0 }
 0x1b9   :  { %v1489_v10 = vpack.c.bf16 %v807_v9, %v806_v8 }
 0x1bb   :  { %v844_v63 = vsel %vm836_vm4, %v1489_v10, 0 }
 0x1bc   :  { %v774_v11 = vpop.f32.mrf.mxu2 }
 0x1bd   :  { %v775_v12 = vadd.f32 %v968_v62, %v774_v11 }
 0x1bf   :  { %v808_v15 = vmax.f32 %v775_v12, 0.0 }
 0x1c4   :  { %v776_v13 = vpop.f32.mrf.mxu2 }
 0x1c5   :  { %v777_v14 = vadd.f32 %v968_v62, %v776_v13 }
 0x1c7   :  { %v809_v16 = vmax.f32 %v777_v14, 0.0 }
 0x1c9   :  { %v823_v17 = vpack.c.bf16 %v809_v16, %v808_v15 }
 0x1cb   :  { %v847_v61 = vsel %vm836_vm4, %v823_v17, 0 }
 0x1cc   :  { %v779_v18 = vpop.f32.mrf.mxu2 }
 0x1cd   :  { %v780_v19 = vadd.f32 %v968_v62, %v779_v18 }
 0x1cf   :  { %v810_v22 = vmax.f32 %v780_v19, 0.0 }
 0x1d4   :  { %v781_v20 = vpop.f32.mrf.mxu2 }
 0x1d5   :  { %v782_v21 = vadd.f32 %v968_v62, %v781_v20 }
 0x1d7   :  { %v811_v23 = vmax.f32 %v782_v21, 0.0 }
 0x1d9   :  { %v824_v24 = vpack.c.bf16 %v811_v23, %v810_v22 }
 0x1db   :  { %v850_v58 = vsel %vm836_vm4, %v824_v24, 0 }
 0x1dc   :  { %v784_v25 = vpop.f32.mrf.mxu2 }
 0x1dd   :  { %v785_v26 = vadd.f32 %v968_v62, %v784_v25 }
 0x1df   :  { %v812_v29 = vmax.f32 %v785_v26, 0.0 }
 0x1e4   :  { %v786_v27 = vpop.f32.mrf.mxu2 }
 0x1e5   :  { %v787_v28 = vadd.f32 %v968_v62, %v786_v27 }
 0x1e7   :  { %v813_v30 = vmax.f32 %v787_v28, 0.0 }
 0x1e9   :  { %v825_v31 = vpack.c.bf16 %v813_v30, %v812_v29 }
 0x1eb   :  { %v853_v57 = vsel %vm836_vm4, %v825_v31, 0 }
 0x1ec   :  { %v789_v32 = vpop.f32.mrf.mxu2 }
 0x1ed   :  { %v790_v51 = vadd.f32 %v968_v62, %v789_v32 }
 0x1ef   :  { %v814_v54 = vmax.f32 %v790_v51, 0.0 }
 0x1f4   :  { %v791_v33 = vpop.f32.mrf.mxu2 }
 0x1f5   :  { %v792_v49 = vadd.f32 %v968_v62, %v791_v33 }
 0x1f7   :  { %v815_v52 = vmax.f32 %v792_v49, 0.0 }
 0x1f9   :  { %v826_v55 = vpack.c.bf16 %v815_v52, %v814_v54 }
 0x1fb   :  { %v856_v56 = vsel %vm836_vm4, %v826_v55, 0 }
 0x1fc   :  { %v794_v34 = vpop.f32.mrf.mxu2 }
 0x1fd   :  { %v795_v44 = vadd.f32 %v968_v62, %v794_v34 }
 0x1ff   :  { %v816_v48 = vmax.f32 %v795_v44, 0.0 }
 0x204   :  { %v796_v35 = vpop.f32.mrf.mxu2 }
 0x205   :  { %v797_v40 = vadd.f32 %v968_v62, %v796_v35 }
 0x207   :  { %v817_v46 = vmax.f32 %v797_v40, 0.0 }
 0x209   :  { %v827_v50 = vpack.c.bf16 %v817_v46, %v816_v48 }
 0x20b   :  { %v859_v53 = vsel %vm836_vm4, %v827_v50, 0 }
 0x20c   :  { %v799_v36 = vpop.f32.mrf.mxu2 }
 0x20d   :  { %v800_v37 = vadd.f32 %v968_v62, %v799_v36 }
 0x20f   :  { %v818_v42 = vmax.f32 %v800_v37, 0.0 }
 0x214   :  { %v801_v38 = vpop.f32.mrf.mxu2 }
 0x215   :  { %v802_v39 = vadd.f32 %v968_v62, %v801_v38  ;;  %v829_v62 = vld [vmem:[#allocation2] sm:$0x1] }
 0x216   :  { %832 = vperm.xlu0 %966, %v829_v62  }
 0x217   :  { %v819_v43 = vmax.f32 %v802_v39, 0.0 }
 0x219   :  { %v828_v45 = vpack.c.bf16 %v819_v43, %v818_v42 }
 0x21b   :  { %v862_v47 = vsel %vm836_vm4, %v828_v45, 0 }
 0x21c   :  { %864 = vmatpush.bf16.xpose.msra.mxu3 %v862_v47 }
 0x224   :  { %865 = vmatpush.bf16.xpose.msra.mxu3 %v859_v53 }
 0x22c   :  { %866 = vmatpush.bf16.xpose.msra.mxu3 %v856_v56 }
 0x234   :  { %867 = vmatpush.bf16.xpose.msra.mxu3 %v853_v57 }
 0x23c   :  { %868 = vmatpush.bf16.xpose.msra.mxu3 %v850_v58 }
 0x244   :  { %869 = vmatpush.bf16.xpose.msra.mxu3 %v847_v61 }
 0x24c   :  { %870 = vmatpush.bf16.xpose.msra.mxu3 %v844_v63 }
 0x254   :  { %871 = vmatpush.bf16.xpose.msra.mxu3 %v841_v0 }
 0x25b   :  { %950 = vmatmul.msk.bf16.vlgmr.msra.gmra.mxu3 %vm836_vm4, %v820_v1 }
 0x288   :  { %v833_v2 = vpop.permute.xlu0 %832 }
 0x289   :  { %v835_v3 = vperm.slane %v833_v2, 0 }
 0x2de   :  { %v873_v5 = vpop.f32.mrf.mxu3 }
 0x2df   :  { %v874_v6 = vadd.f32 %v873_v5, %v835_v3 }
 0x2e1   :  { %877 = vst [vmem:[%s1520_s9] sm:$0x1] %v874_v6 }
 0x2e6   :  { %v875_v41 = vpop.f32.mrf.mxu3 }

</bundles_post_ra>
